<compile_context>
chip_gen: v5e
topology: v5e:2x2
jax: 0.10.0
libtpu: 0.0.40
codegen_flags: <defaults>
</compile_context>

<pallas_src>
import functools

import jax
import jax.numpy as jnp
from jax.experimental import pallas as pl
from jax.experimental.pallas import tpu as pltpu


# sublane packing multiples per element size (f32 -> 8, bf16/f16 -> 16)
_SUBLANE_MULT = {4: 8, 2: 16, 1: 32}
_MIN_GRID_STEPS = 4  # keep the pipeline + both v7x TensorCores busy


def _swish_kernel(x_ref, o_ref, *, compute_dtype):
    x = x_ref[...].astype(compute_dtype)
    # sigmoid(x) == 0.5 * (tanh(0.5 * x) + 1): single EUP transcendental,
    # numerically stable for all x.
    sig = 0.5 * (jnp.tanh(0.5 * x) + 1.0)
    o_ref[...] = (x * sig).astype(o_ref.dtype)


def _bf16_compute_ok():
    """True if the local TPU generation has bf16 VPU/EUP (v6e, v7x)."""
    try:
        kind = jax.devices()[0].device_kind.lower()
    except Exception:
        return False
    if "tpu" not in kind:
        return False
    for old in ("v2", "v3", "v4", "v5"):
        if old in kind:
            return False
    return True


def swish(x, *, target_block_bytes=4 * 1024 * 1024):
    """Elementwise x * sigmoid(x) (Swish / SiLU). Any shape; float dtypes."""
    orig_shape = x.shape
    dtype = x.dtype
    n = x.size
    if n == 0:
        return x

    # Non-float dtypes: plain-JAX fallback (torch.sigmoid would reject ints).
    if dtype not in (jnp.dtype(jnp.float32), jnp.dtype(jnp.bfloat16),
                     jnp.dtype(jnp.float16)):
        xf = x.astype(jnp.float32)
        return (xf * jax.nn.sigmoid(xf)).astype(dtype)

    compute_dtype = jnp.float32
    if dtype == jnp.bfloat16 and _bf16_compute_ok():
        compute_dtype = jnp.bfloat16

    itemsize = jnp.dtype(dtype).itemsize
    sub = _SUBLANE_MULT[itemsize]

    x_flat = x.reshape(-1)
    tail = n % 128
    n_main = n - tail

    # Tiny (<128 elems) tail handled in plain jnp — no padding, no out-slice.
    tail_out = None
    if tail:
        xt = x_flat[n_main:].astype(compute_dtype)
        tail_out = (xt * (0.5 * (jnp.tanh(0.5 * xt) + 1.0))).astype(dtype)
        if n_main == 0:
            return tail_out.reshape(orig_shape)

    # ---- lane-dense 2-D slab for the 128-aligned prefix --------------------
    lanes = 128
    for cand in (2048, 1024, 512, 256):
        if n_main % cand == 0:
            lanes = cand
            break
    rows = n_main // lanes
    x2d = x_flat[:n_main].reshape(rows, lanes)

    # ---- block sizing -------------------------------------------------------
    if rows <= sub:
        tile_rows = rows  # full-dim block (tiny arrays)
    else:
        target_rows = max(sub,
                          (target_block_bytes // (lanes * itemsize)) // sub * sub)
        if rows >= _MIN_GRID_STEPS * sub:
            # cap so the grid has at least _MIN_GRID_STEPS steps
            cap = max(sub, (rows // _MIN_GRID_STEPS) // sub * sub)
        else:
            cap = sub
        tile_rows = min(target_rows, cap)
    grid = (pl.cdiv(rows, tile_rows),)  # ragged last row-block is masked

    kernel = functools.partial(_swish_kernel, compute_dtype=compute_dtype)
    out2d = pl.pallas_call(
        kernel,
        out_shape=jax.ShapeDtypeStruct((rows, lanes), dtype),
        grid_spec=pltpu.PrefetchScalarGridSpec(
            num_scalar_prefetch=0,
            grid=grid,
            in_specs=[pl.BlockSpec((tile_rows, lanes), lambda i: (i, 0))],
            out_specs=pl.BlockSpec((tile_rows, lanes), lambda i: (i, 0)),
        ),
        compiler_params=pltpu.CompilerParams(
            dimension_semantics=("parallel",),      # megacore sharding on v7x
            vmem_limit_bytes=32 * 1024 * 1024,      # safe on v5e/v6e/v7x
        ),
    )(x2d)

    out_flat = out2d.reshape(-1)
    if tail:
        out_flat = jnp.concatenate([out_flat, tail_out])
    return out_flat.reshape(orig_shape)


if __name__ == "__main__":
    key = jax.random.PRNGKey(0)
    x = jax.random.normal(key, (2, 4, 16, 16), dtype=jnp.float32)  # NCHW

    y = swish(x)
    jax.block_until_ready(y)

    # sanity check against plain JAX reference
    y_ref = x * jax.nn.sigmoid(x)
    assert y.shape == x.shape and y.dtype == x.dtype
    assert jnp.allclose(y, y_ref, atol=1e-3, rtol=1e-3), float(
        jnp.max(jnp.abs(y - y_ref))
    )

    print("KERNEL_OK")
</pallas_src>

<mosaic_0001>
module attributes {stable_mosaic.version = 11 : i64} {
  func.func @_swish_kernel(%arg0: i32, %arg1: memref<1x2048xf32, #tpu.memory_space<vmem>>, %arg2: memref<1x2048xf32, #tpu.memory_space<vmem>>) attributes {dimension_semantics = [#tpu.dimension_semantics<parallel>], iteration_bounds = array<i64: 1>, scalar_prefetch = 0 : i64, scratch_operands = 0 : i64, tpu.core_type = #tpu.core_type<tc>, window_params = [{transform_indices = @transform_0, window_bounds = array<i64: 1, 2048>}, {transform_indices = @transform_1, window_bounds = array<i64: 1, 2048>}]} {
    %c0 = arith.constant 0 : index
    %c0_0 = arith.constant 0 : index
    %0 = vector.load %arg1[%c0, %c0_0] : memref<1x2048xf32, #tpu.memory_space<vmem>>, vector<1x2048xf32>
    %cst = arith.constant 5.000000e-01 : f32
    %1 = vector.broadcast %cst : f32 to vector<1x2048xf32>
    %2 = arith.mulf %1, %0 : vector<1x2048xf32>
    %3 = math.tanh %2 : vector<1x2048xf32>
    %cst_1 = arith.constant 1.000000e+00 : f32
    %4 = vector.broadcast %cst_1 : f32 to vector<1x2048xf32>
    %5 = arith.addf %3, %4 : vector<1x2048xf32>
    %cst_2 = arith.constant 5.000000e-01 : f32
    %6 = vector.broadcast %cst_2 : f32 to vector<1x2048xf32>
    %7 = arith.mulf %6, %5 : vector<1x2048xf32>
    %8 = arith.mulf %0, %7 : vector<1x2048xf32>
    %c0_3 = arith.constant 0 : index
    %c0_4 = arith.constant 0 : index
    %9 = vector.load %arg2[%c0_3, %c0_4] : memref<1x2048xf32, #tpu.memory_space<vmem>>, vector<1x2048xf32>
    tpu.vector_store %arg2[%c0_3, %c0_4], %8 {strides = array<i32>} : memref<1x2048xf32, #tpu.memory_space<vmem>>, vector<1x2048xf32>,
    return
  }
  func.func @transform_0(%arg0: i32) -> (i32, i32) {
    %c0_i32 = arith.constant 0 : i32
    %c0_i32_0 = arith.constant 0 : i32
    return %arg0, %c0_i32 : i32, i32
  }
  func.func @transform_1(%arg0: i32) -> (i32, i32) {
    %c0_i32 = arith.constant 0 : i32
    %c0_i32_0 = arith.constant 0 : i32
    return %arg0, %c0_i32 : i32, i32
  }
}

</mosaic_0001>

<bundles_post_ra>
// kernel: tpu_custom_call.1
= control target key start
LH: loop header
LB: loop body
LE: loop exit
PB: predicated region body
PF: predicated region fallthrough
CT: control target
= control target key end

     0   :  { %6 = vsyncpa [#allocation3], 0  ;;  %s130_s0 = inlined_call_operand.hbm [shape: f32[1,2048], index: 0, kind: input, shape index: {}]   ;;  %s131_s1 = inlined_call_operand.hbm [shape: f32[1,2048], index: 1, kind: output, shape index: {}]  }
   0x1   :  { %7 = vsyncpa [#allocation4], 0  ;;  %s13_s8 = sshll.u32 %s130_s0, 4  ;;  %s112_s9 = smov [#allocation2]   ;;  %s14_s8 = int_to_ptr.hbm [resolvable:$true] %s13_s8 }
   0x2   :  { %s15_s10 = sshll.u32 %s112_s9, 4  ;;  %s16_s10 = int_to_ptr.vmem [resolvable:$true] %s15_s10 }
   0x3   :  { %18 = dma.hbm_to_vmem [thread:$0]  %s14_s8, 256, %s16_s10, [#allocation3]  }
   0x4   :  { %108 = dma.done.wait [#allocation3], 256  }
   0x5   :  { %109 = vsyncadd [#allocation3], 4294967040  ;;  %v23_v0 = vld [vmem:[#allocation2] sm:$0xff]  ;;  %v24_v1 = vld [vmem:[#allocation2 + $0x8] sm:$0xff]  ;;  %s113_s11 = smov [#allocation5]   ;;  %s44_s14 = sshll.u32 %s131_s1, 4  ;;  %s45_s14 = int_to_ptr.hbm [resolvable:$true] %s44_s14 }
   0x6   :  { %v25_v2 = vmul.f32 0.5, %v23_v0  ;;  %v26_v3 = vmul.f32 0.5, %v24_v1  ;;  %s42_s0 = sshll.u32 %s113_s11, 4  ;;  %s43_s0 = int_to_ptr.vmem [resolvable:$true] %s42_s0 }
   0x8   :  { %56 = vtanh.f32 %v25_v2 }
   0x9   :  { %58 = vtanh.f32 %v26_v3 }
   0xe   :  { %v57_v4 = vpop.eup %56 }
   0xf   :  { %v59_v5 = vpop.eup %58  ;;  %v29_v6 = vadd.f32 1.0, %v57_v4 }
  0x10   :  { %v30_v7 = vadd.f32 1.0, %v59_v5 }
  0x11   :  { %v31_v8 = vmul.f32 0.5, %v29_v6 }
  0x12   :  { %v32_v9 = vmul.f32 0.5, %v30_v7 }
  0x13   :  { %v33_v10 = vmul.f32 %v31_v8, %v23_v0 }
  0x14   :  { %v34_v11 = vmul.f32 %v32_v9, %v24_v1 }
  0x15   :  { %35 = vst [vmem:[#allocation5] sm:$0xff] %v33_v10 }
  0x16   :  { %36 = vst [vmem:[#allocation5 + $0x8] sm:$0xff] %v34_v11 }
  0x17   :  { %47 = dma.vmem_to_hbm [thread:$0]  %s43_s0, 256, %s45_s14, [#allocation4]  }
  0x18   :  { %110 = dma.done.wait [#allocation4], 256  }
  0x19   :  { %111 = vsyncadd [#allocation4], 4294967040 }
  0x1a   :  { %52 = vsyncpa [#allocation3], 1 }
  0x1b   :  { %53 = vsyncpa [#allocation4], 1 }

</bundles_post_ra>
